<compile_context>
chip_gen: v5e
topology: v5e:2x2
jax: 0.10.0
libtpu: 0.0.40
codegen_flags: <defaults>
</compile_context>

<pallas_src>
import math
import functools

import jax
import jax.numpy as jnp
from jax.experimental import pallas as pl
from jax.experimental.pallas import tpu as pltpu


def make_pe(max_len: int, d_model: int) -> jnp.ndarray:
    """Sinusoidal positional-encoding buffer, shape (1, max_len, d_model), fp32."""
    position = jnp.arange(max_len, dtype=jnp.float32)[:, None]               # (L, 1)
    div_term = jnp.exp(
        jnp.arange(0, d_model, 2, dtype=jnp.float32) * (-(math.log(10000.0) / d_model))
    )                                                                         # (D/2,)
    angles = position * div_term                                              # (L, D/2)
    pe = jnp.zeros((max_len, d_model), dtype=jnp.float32)
    pe = pe.at[:, 0::2].set(jnp.sin(angles))
    pe = pe.at[:, 1::2].set(jnp.cos(angles))
    return pe[None]                                                           # (1, L, D)


# ----------------------------- dropout hashing ------------------------------

def _mix_u32(idx_u32, seed_u32):
    """Stateless 32-bit mixing hash (murmur3-style finalizer) -> uniform uint32."""
    h = idx_u32 * jnp.uint32(0x9E3779B1) + seed_u32 * jnp.uint32(0x85EBCA77)
    h = h ^ (h >> 16)
    h = h * jnp.uint32(0x7FEB352D)
    h = h ^ (h >> 15)
    h = h * jnp.uint32(0x846CA68B)
    h = h ^ (h >> 16)
    return h


def _keep_threshold_31(p: float) -> int:
    # Drop iff hash_low31 < threshold  =>  keep prob = 1 - threshold / 2^31 ~= 1 - p.
    # (p -> 1.0 is clamped to 2^31 - 1, i.e. keep prob ~2^-31 instead of exactly 0;
    #  negligible for any practical dropout rate.)
    t = int(round(p * float(1 << 31)))
    return max(0, min(t, (1 << 31) - 1))


def dropout_keep_mask_ref(seed: int, shape, p: float):
    """Pure-JAX replica of the in-kernel mask (bit-exact), for testing."""
    n = 1
    for s in shape:
        n *= s
    idx = jnp.arange(n, dtype=jnp.int32).astype(jnp.uint32).reshape(shape)
    h = _mix_u32(idx, jnp.uint32(seed))
    h31 = (h & jnp.uint32(0x7FFFFFFF)).astype(jnp.int32)
    return h31 >= jnp.int32(_keep_threshold_31(p))


# ------------------------------- layout choice -------------------------------

def _choose_layout(L: int, D: int):
    """Reshape the per-batch (L, D) slab to (R, C) with C a lane-dense multiple
    of 128 when possible (unmasked vector stores even for small d_model)."""
    N = L * D
    first_fit = None
    for C in (1024, 512, 256, 128):
        if N % C == 0:
            R = N // C
            if first_fit is None:
                first_fit = (R, C)
            if R % 8 == 0 or R == 1:          # sublane-friendly too
                return R, C
    if first_fit is not None:
        return first_fit
    return L, D                               # fallback: original (masked lanes)


def _choose_row_tile(R: int, C: int, itemsize: int,
                     target_bytes: int = 2 * 1024 * 1024) -> int:
    """Largest row tile TR that (a) divides R, (b) is a multiple of 8 or == R,
    and (c) keeps one block around ~2 MiB so the pipelined footprint fits the
    smallest scoped-VMEM default (v5e: 16 MiB)."""
    max_rows = max(1, target_bytes // (C * itemsize))
    if R <= max_rows:
        return R
    best = 0
    for t in range(8, min(R, max_rows) + 1, 8):
        if R % t == 0:
            best = t
    return best if best > 0 else R


# --------------------------------- kernel ------------------------------------

def _pe_dropout_kernel(seed_ref, x_ref, pe_ref, o_ref, *, p: float,
                       training: bool, rows_total: int):
    # x_ref: (1, TR, C), pe_ref: (TR, C), o_ref: (1, TR, C)
    y = x_ref[0] + pe_ref[...]                                  # elementwise add

    if training and p > 0.0:
        TR, C = pe_ref.shape
        r = pl.program_id(0)                                    # row-tile (outer)
        b = pl.program_id(1)                                    # batch (inner)
        row0 = b * rows_total + r * TR                          # global first row
        rows = jax.lax.broadcasted_iota(jnp.int32, (TR, C), 0)
        cols = jax.lax.broadcasted_iota(jnp.int32, (TR, C), 1)
        idx = ((row0 + rows) * C + cols).astype(jnp.uint32)     # global element idx
        seed = seed_ref[0].astype(jnp.uint32)
        h = _mix_u32(idx, seed)
        h31 = (h & jnp.uint32(0x7FFFFFFF)).astype(jnp.int32)    # signed-safe compare
        keep = h31 >= jnp.int32(_keep_threshold_31(p))
        scale = jnp.float32(1.0 / (1.0 - p))
        y = jnp.where(keep, y * scale, jnp.zeros_like(y))

    o_ref[0] = y.astype(o_ref.dtype)


# -------------------------------- wrapper -------------------------------------

def positional_encoding_forward(x, pe, seed: int, *, p: float, training: bool):
    """x: (B, L, D); pe: (1, L, D).  Returns (B, L, D), same dtype as x."""
    B, L, D = x.shape
    assert pe.shape == (1, L, D)

    R, C = _choose_layout(L, D)
    TR = _choose_row_tile(R, C, jnp.dtype(x.dtype).itemsize)
    assert R % TR == 0

    x2 = x.reshape(B, R, C)
    pe2 = pe.astype(x.dtype).reshape(R, C)
    seed_arr = jnp.asarray([seed], dtype=jnp.int32)

    kernel = functools.partial(
        _pe_dropout_kernel, p=float(p), training=bool(training), rows_total=R)

    itemsize = jnp.dtype(x.dtype).itemsize
    cost = pl.CostEstimate(
        flops=4 * B * L * D,
        transcendentals=0,
        bytes_accessed=(2 * B * L * D + L * D) * itemsize,
    )

    out2 = pl.pallas_call(
        kernel,
        out_shape=jax.ShapeDtypeStruct((B, R, C), x.dtype),
        grid_spec=pltpu.PrefetchScalarGridSpec(
            num_scalar_prefetch=1,                      # seed lands in SMEM
            grid=(R // TR, B),                          # batch innermost -> pe resident
            in_specs=[
                pl.BlockSpec((1, TR, C), lambda r, b, seed: (b, r, 0)),   # x tile
                pl.BlockSpec((TR, C), lambda r, b, seed: (r, 0)),         # pe (bcast B)
            ],
            out_specs=pl.BlockSpec((1, TR, C), lambda r, b, seed: (b, r, 0)),
        ),
        compiler_params=pltpu.CompilerParams(
            # Mask is a stateless hash of the global index -> no cross-step carry,
            # safe to shard across v7x's two TensorCores.
            dimension_semantics=("parallel", "parallel"),
        ),
        cost_estimate=cost,
    )(seed_arr, x2, pe2)

    return out2.reshape(B, L, D)


# ---------------------------------- demo --------------------------------------

if __name__ == "__main__":
    # Small shapes consistent with the module: batch=2, seq(max_len)=8, d_model=32.
    B, L, D = 2, 8, 32
    P_DROP = 0.1

    key = jax.random.PRNGKey(0)
    x = jax.random.normal(key, (B, L, D), dtype=jnp.float32)
    pe = make_pe(max_len=L, d_model=D)

    # Eval mode (dropout = identity): must match x + pe.
    out_eval = jax.block_until_ready(
        positional_encoding_forward(x, pe, seed=0, p=P_DROP, training=False))
    ref = x + pe
    assert jnp.allclose(out_eval, ref, atol=1e-6), "eval-mode mismatch vs x + pe"

    # Train mode: compare against the bit-exact pure-JAX replica of the mask.
    SEED = 1234
    out_train = jax.block_until_ready(
        positional_encoding_forward(x, pe, seed=SEED, p=P_DROP, training=True))
    assert out_train.shape == (B, L, D)
    keep = dropout_keep_mask_ref(SEED, (B, L, D), P_DROP)
    expected = jnp.where(keep, ref * jnp.float32(1.0 / (1.0 - P_DROP)),
                         jnp.zeros_like(ref))
    assert jnp.allclose(out_train, expected, atol=1e-6), "train-mode dropout mismatch"

    print("KERNEL_OK")
</pallas_src>

<mosaic_0001>
module attributes {stable_mosaic.version = 11 : i64} {
  func.func @_pe_dropout_kernel(%arg0: i32, %arg1: i32, %arg2: memref<1xi32, #tpu.memory_space<smem>>, %arg3: memref<1x1x256xf32, #tpu.memory_space<vmem>>, %arg4: memref<1x256xf32, #tpu.memory_space<vmem>>, %arg5: memref<1x1x256xf32, #tpu.memory_space<vmem>>) attributes {dimension_semantics = [#tpu.dimension_semantics<parallel>, #tpu.dimension_semantics<parallel>], iteration_bounds = array<i64: 1, 2>, scalar_prefetch = 1 : i64, scratch_operands = 0 : i64, tpu.core_type = #tpu.core_type<tc>, window_params = [{transform_indices = @transform_0, window_bounds = array<i64: 1, 1, 256>}, {transform_indices = @transform_1, window_bounds = array<i64: 1, 256>}, {transform_indices = @transform_2, window_bounds = array<i64: 1, 1, 256>}]} {
    %c0 = arith.constant 0 : index
    %c0_0 = arith.constant 0 : index
    %c0_1 = arith.constant 0 : index
    %0 = vector.load %arg3[%c0, %c0_0, %c0_1] : memref<1x1x256xf32, #tpu.memory_space<vmem>>, vector<1x1x256xf32>
    %1 = vector.shape_cast %0 : vector<1x1x256xf32> to vector<1x256xf32>
    %c0_2 = arith.constant 0 : index
    %c0_3 = arith.constant 0 : index
    %2 = vector.load %arg4[%c0_2, %c0_3] : memref<1x256xf32, #tpu.memory_space<vmem>>, vector<1x256xf32>
    %3 = arith.addf %1, %2 : vector<1x256xf32>
    %c0_4 = arith.constant 0 : index
    %c0_5 = arith.constant 0 : index
    %c0_6 = arith.constant 0 : index
    %4 = vector.load %arg5[%c0_4, %c0_5, %c0_6] : memref<1x1x256xf32, #tpu.memory_space<vmem>>, vector<1x1x256xf32>
    %5 = vector.shape_cast %4 : vector<1x1x256xf32> to vector<1x256xf32>
    %6 = vector.shape_cast %3 : vector<1x256xf32> to vector<1x1x256xf32>
    tpu.vector_store %arg5[%c0_4, %c0_5, %c0_6], %6 {strides = array<i32>} : memref<1x1x256xf32, #tpu.memory_space<vmem>>, vector<1x1x256xf32>,
    return
  }
  func.func @transform_0(%arg0: i32, %arg1: i32, %arg2: memref<1xi32, #tpu.memory_space<smem>>) -> (i32, i32, i32) {
    %c0_i32 = arith.constant 0 : i32
    %c0_i32_0 = arith.constant 0 : i32
    return %arg1, %arg0, %c0_i32 : i32, i32, i32
  }
  func.func @transform_1(%arg0: i32, %arg1: i32, %arg2: memref<1xi32, #tpu.memory_space<smem>>) -> (i32, i32) {
    %c0_i32 = arith.constant 0 : i32
    %c0_i32_0 = arith.constant 0 : i32
    return %arg0, %c0_i32 : i32, i32
  }
  func.func @transform_2(%arg0: i32, %arg1: i32, %arg2: memref<1xi32, #tpu.memory_space<smem>>) -> (i32, i32, i32) {
    %c0_i32 = arith.constant 0 : i32
    %c0_i32_0 = arith.constant 0 : i32
    return %arg1, %arg0, %c0_i32 : i32, i32, i32
  }
}

</mosaic_0001>

<bundles_post_ra>
// kernel: tpu_custom_call.1
= control target key start
LH: loop header
LB: loop body
LE: loop exit
PB: predicated region body
PF: predicated region fallthrough
CT: control target
= control target key end

     0   :  { %9 = vsyncpa [#allocation5], 0  ;;  %s654_s0 = inlined_call_operand.<no memory space> [shape: s32[1], index: 0, kind: input, shape index: {}]   ;;  %s655_s1 = inlined_call_operand.hbm [shape: f32[2,1,256], index: 1, kind: input, shape index: {}]   ;;  %s656_s2 = inlined_call_operand.vmem [shape: f32[1,256], index: 2, kind: input, shape index: {}]   ;;  %s657_s3 = inlined_call_operand.hbm [shape: f32[2,1,256], index: 3, kind: output, shape index: {}]  }
   0x1   :  { %11 = vsyncpa [#allocation5 + $0x1], 0 }
   0x2   :  { %12 = vsyncpa [#allocation6], 0 }
   0x3   :  { %14 = vsyncpa [#allocation6 + $0x1], 0  ;;  %s531_s12 = smov 0   ;;  %s533_s13 = smov 0  }
   0x4   :  { %s535_s14 = smov 0   ;;  %s537_s0 = smov 0  }
   0x5   :  { %s539_s15 = smov 0   ;;  %s541_s16 = smov 0  }
   0x6 LB: > { %s321_s17 = sadd.s32 4294967295, %s509_s16   ;;  %s322_s18 = sadd.s32 4294967294, %s509_s16   ;;  %s509_s16 = sphi %s541_s16, %s20_s16   ;;  %s505_s15 = sphi %s539_s15, %s666_s15   ;;  %s501_s0 = sphi %s537_s0, %s665_s0   ;;  %s497_s14 = sphi %s535_s14, %s664_s14   ;;  %s493_s13 = sphi %s533_s13, %s663_s13   ;;  %s489_s12 = sphi %s531_s12, %s662_s12  }
   0x7   : > { %s29_s19 = sadd.s32 1, %s505_s15  ;;  %s41_s20 = sadd.s32 1, %s497_s14 }
   0x8   : > { %p30_p0 = scmp.ge.s32.totalorder %s29_s19, 2  ;;  %p48_p1 = scmp.ne.s32.totalorder %s497_s14, %s493_s13 }
   0x9   : > { %p49_p2 = scmp.eq.s32.totalorder %s509_s16, 0  ;;  %p54_p3 = scmp.ne.s32.totalorder %s493_s13, %s489_s12 }
   0xa   : > { %s668_s19 = smov (%p30_p0, %s29_s19), 0  ;;  %p55_p5 = scmp.eq.s32.totalorder %s321_s17, 0 }
   0xb   : > { %p572_p4 = por %p49_p2, %p48_p1  ;;  %s36_s22 = ssub.s32 %s505_s15, %s668_s19 }
   0xc   : > { %p106_p6 = scmp.eq.s32.totalorder %s321_s17, 1  ;;  %p39_p7 = scmp.eq.s32.totalorder %s36_s22, 0 }
   0xd   : > { %p578_p8 = por %p55_p5, %p54_p3  ;;  %p112_p10 = scmp.eq.s32.totalorder %s322_s18, 1 }
   0xe   : > { %p582_p9 = por %p106_p6, %p48_p1  ;;  %p325_p12 = scmp.ge.s32.totalorder %s509_s16, 2 }
   0xf   : > { %s587_s25 = scalar_select %p39_p7, %s497_s14, %s41_s20  }
  0x10   : > { %p589_p11 = por %p112_p10, %p54_p3  ;;  %p347_p13 = scmp.lt.s32.totalorder %s509_s16, 2 }
  0x11   : > { %s139_s27 = sand.u32 1, %s497_s14   ;;  %s327_s29 = sshll.u32 %s505_s15, 1 }
  0x12   : > { %s326_s28 = sshll.u32 %s139_s27, 1  ;;  %s149_s5 = scalar_lea.hbm %s655_s1, %s327_s29 }
  0x13   : > { %s143_s6 = scalar_lea.vmem [#allocation4], %s326_s28  ;;  %s151_s8 = sshll.u32 %s149_s5, 4  ;;  %s152_s8 = int_to_ptr.hbm [resolvable:$true] %s151_s8 }
  0x14   : > { %s153_s7 = sshll.u32 %s143_s6, 4  ;;  %p340_p0 = pnand %p347_p13, %p572_p4  ;;  %s154_s7 = int_to_ptr.vmem [resolvable:$true] %s153_s7 }
  0x15   : > { %p328_p1 = scmp.ge.s32.totalorder %s509_s16, 1  ;;  %p158_p2 = scmp.lt.s32.totalorder %s509_s16, 3 }
  0x16   : > { %s140_s9 = scalar_lea.sflag [#allocation5], %s139_s27 }
  0x17   : > { %342 = dma.hbm_to_vmem [thread:$0]  (!%p340_p0), %s152_s8, 32, %s154_s7, %s140_s9  }
  0x18   : > { %p159_p3 = pnand %p328_p1, %p158_p2 }
  0x19   : > { %s605_s10 = sand.u32 (!%p159_p3), 1, %s493_s13  }
  0x1a   : > { %162 = sbr.rel (%p159_p3) target bundleno = 47 (0x2f), region = 28  ;;  %s329_s11 = sshll.u32 (!%p159_p3), %s605_s10, 1 }
  0x1b   : > { %s165_s17 = scalar_lea.sflag (!%p159_p3), [#allocation5], %s605_s10  ;;  %s168_s18 = scalar_lea.vmem (!%p159_p3), [#allocation4], %s329_s11 }
  0x1f   : > { %480 = dma.done.wait (%p578_p8), %s165_s17, 32  }
  0x20   : > { %482 = vsyncadd (%p578_p8), %s165_s17, 4294967264  ;;  %s332_s20 = sshll.u32 %s501_s0, 1  ;;  %v201_v0 = vlaneseq  ;;  %s193_s28 = scalar_lea.vmem [#allocation7], %s329_s11  ;;  %v198_v1 = vld [vmem:[%s168_s18] sm:$0x3] }
  0x21   : > { %s219_s27 = scalar_lea.hbm %s657_s3, %s332_s20  ;;  %s221_s29 = sshll.u32 %s193_s28, 4  ;;  %v199_v2 = vld [vmem:[%s656_s2] sm:$0x3]  ;;  %s222_s29 = int_to_ptr.vmem [resolvable:$true] %s221_s29 }
  0x22   : > { %s223_s30 = sshll.u32 %s219_s27, 4  ;;  %vm203_vm0 = vcmp.lt.s32.totalorder %v201_v0, 256  ;;  %v200_v3 = vadd.f32 %v199_v2, %v198_v1  ;;  %s207_s0 = scalar_lea.sflag [#allocation6], %s605_s10  ;;  %s224_s30 = int_to_ptr.hbm [resolvable:$true] %s223_s30 }
  0x23   : > { %s441_s23 = sshra.s32 %s224_s30, 4  ;;  %s447_s9 = scalar_lea.hbm %s657_s3, 4  ;;  %s442_s23 = int_to_ptr.hbm [resolvable:$true] %s441_s23 }
  0x24   : > { %205 = vst.msk [vmem:[%s193_s28] sm:$0x3] %vm203_vm0, %v200_v3  ;;  %s443_s6 = scalar_lea.hbm %s442_s23, 2  ;;  %p448_p7 = scmp.lt.s32.totalorder %s442_s23, %s657_s3 }
  0x25   : > { %p444_p4 = scmp.ne.s32.totalorder %s442_s23, %s443_s6  ;;  %p449_p8 = scmp.lt.s32.totalorder %s447_s9, %s443_s6 }
  0x27   : > { %p445_p5 = pnand %p444_p4, %p582_p9  ;;  %p450_p10 = por %p449_p8, %p448_p7 }
  0x29   : > { %p446_p6 = pneg %p445_p5 }
  0x2b   : > { %p451_p13 = pnand %p450_p10, %p446_p6 }
  0x2d   : > { %454 = shalt.err (!%p451_p13)
}
  0x2e   : > { %337 = dma.vmem_to_hbm [thread:$0]  (%p582_p9), %s222_s29, 32, %s224_s30, %s207_s0  }
  0x2f PF: > { %s235_s10 = sand.u32 1, %s489_s12   ;;  %p344_p0 = pnand %p325_p12, %p589_p11 }
  0x30   : > { %s236_s18 = scalar_lea.sflag [#allocation6], %s235_s10 }
  0x31   : > { %p345_p1 = pneg %p344_p0 }
  0x33   : > { %484 = dma.done.wait (%p345_p1), %s236_s18, 32  }
  0x34   : > { %486 = vsyncadd (%p345_p1), %s236_s18, 4294967264  ;;  %s20_s16 = sadd.s32 1, %s509_s16   ;;  %s662_s12 = smov %s493_s13 }
  0x35   : > { %p17_p2 = scmp.ge.s32.totalorder %s20_s16, 4   ;;  %s663_s13 = smov %s497_s14 }
  0x36   : > { %s664_s14 = smov %s587_s25  ;;  %s665_s0 = smov %s505_s15 }
  0x37   : > { %s666_s15 = smov %s668_s19  ;;  %19 = sbr.rel (!%p17_p2) target bundleno = 6 (0x6), region = 76 }
  0x3c   :  { %242 = vsyncpa [#allocation5], 1 }
  0x3d   :  { %244 = vsyncpa [#allocation5 + $0x1], 1 }
  0x3e   :  { %245 = vsyncpa [#allocation6], 1 }
  0x3f   :  { %247 = vsyncpa [#allocation6 + $0x1], 1 }

</bundles_post_ra>
